<compile_context>
chip_gen: v7x
topology: tpu7x:2x2x1
jax: 0.10.0
libtpu: 0.0.40
codegen_flags: <defaults>
</compile_context>

<pallas_src>
import functools

import jax
import jax.numpy as jnp
from jax.experimental import pallas as pl
from jax.experimental.pallas import tpu as pltpu


# ----------------------------------------------------------------------------
# Generation-gated tuning knobs
# ----------------------------------------------------------------------------
def _tpu_kind():
    try:
        return jax.devices()[0].device_kind.lower()
    except Exception:
        return ""


_KIND = _tpu_kind()
_BIG_VMEM = ("v5" in _KIND) or ("v6" in _KIND)          # 128 MiB physical VMEM parts
_VMEM_LIMIT = (96 if _BIG_VMEM else 32) * 1024 * 1024   # v7x (64 MiB) / unknown stay at 32
# bf16 EUP exp exists on v6e/v7x only; keep f32 exp on v5e / unknown parts.
_EXP_DTYPE = (
    jnp.bfloat16 if (("v6" in _KIND) or ("v7" in _KIND) or ("7x" in _KIND)) else jnp.float32
)
_TQ_TARGET = 256 if "v6" in _KIND else 128               # v5e MXU saturates at 128; v7x VMEM-tight
_TN_PROJ = 1024 if _BIG_VMEM else 512
_TN_EPI = 1024 if _BIG_VMEM else 512


def _spatial_tile(total, target):
    """Lane-dim tile: full extent when small (always a legal block shape),
    otherwise a multiple-of-128 tile with a cdiv grid and a masked partial last
    tile.  No divisor-search cliffs, no host-side padding pass."""
    return total if total <= target else target


def _const_spec(block_shape, index_map):
    """BlockSpec for a block whose index is (mostly) constant: single-buffer it
    to halve its VMEM residency.  Falls back if pipeline_mode is unsupported."""
    try:
        return pl.BlockSpec(block_shape, index_map, pipeline_mode=pl.Buffered(1))
    except Exception:
        return pl.BlockSpec(block_shape, index_map)


# ----------------------------------------------------------------------------
# Fused projection: channel-major matmul on native (B, Cin, N) layout.
#   y = w_all @ x_blk + b_all  (bf16 MXU operands, f32 accum, bf16 stores)
#   rows of y: [keys(ck) | values(cv) | res-deconv(8*Cout) | q-deconv(8*ck)]
# ----------------------------------------------------------------------------
def _proj_kernel(x_ref, w_ref, b_ref, kv_ref, res_ref, q_ref, *, ckv, cres):
    y = (
        jnp.dot(w_ref[...], x_ref[...].astype(jnp.bfloat16),
                preferred_element_type=jnp.float32)
        + b_ref[...]
    )
    kv_ref[...] = y[:ckv].astype(jnp.bfloat16)
    res_ref[...] = y[ckv:ckv + cres].astype(jnp.bfloat16)
    q_ref[...] = y[ckv + cres:].astype(jnp.bfloat16)


def fused_projection(x3, w_all, b_all, ck, cv, c_out):
    """x3: (B, Cin, N) f32 -> kv (B, ck+cv, N), res_pre (B, 8*Cout, N),
    q_pre (B, 8*ck, N), all bf16."""
    B, Cin, N = x3.shape
    ckv, cres, cq = ck + cv, 8 * c_out, 8 * ck
    ctot = ckv + cres + cq
    tn = _spatial_tile(N, _TN_PROJ)
    kern = functools.partial(_proj_kernel, ckv=ckv, cres=cres)
    return pl.pallas_call(
        kern,
        out_shape=(
            jax.ShapeDtypeStruct((B, ckv, N), jnp.bfloat16),
            jax.ShapeDtypeStruct((B, cres, N), jnp.bfloat16),
            jax.ShapeDtypeStruct((B, cq, N), jnp.bfloat16),
        ),
        grid=(B, pl.cdiv(N, tn)),
        in_specs=[
            pl.BlockSpec((None, Cin, tn), lambda b, i: (b, 0, i)),
            _const_spec((ctot, Cin), lambda b, i: (0, 0)),
            _const_spec((ctot, 1), lambda b, i: (0, 0)),
        ],
        out_specs=(
            pl.BlockSpec((None, ckv, tn), lambda b, i: (b, 0, i)),
            pl.BlockSpec((None, cres, tn), lambda b, i: (b, 0, i)),
            pl.BlockSpec((None, cq, tn), lambda b, i: (b, 0, i)),
        ),
        compiler_params=pltpu.CompilerParams(
            dimension_semantics=("parallel", "parallel"),
            vmem_limit_bytes=_VMEM_LIMIT,
        ),
    )(x3, w_all, b_all)


# ----------------------------------------------------------------------------
# Query-tiled attention.  kv resident per batch (Buffered(1)), bf16 operands,
# f32 max/sum, generation-gated exp dtype, approx reciprocal on the denom.
# (Scale 1/sqrt(ck) is pre-folded into the q weights/bias.)
# ----------------------------------------------------------------------------
def _attn_kernel(q_ref, kv_ref, o_ref, *, ck):
    # q: (ck, tq) bf16 channel-major, kv: (ck+cv, N) bf16
    k = kv_ref[:ck, :]
    v = kv_ref[ck:, :]
    s = jax.lax.dot_general(q_ref[...], k, (((0,), (0,)), ((), ())),
                            preferred_element_type=jnp.float32)      # (tq, N)
    m = jnp.max(s, axis=-1, keepdims=True)
    e = jnp.exp((s - m).astype(_EXP_DTYPE))
    denom = jnp.sum(e.astype(jnp.float32), axis=-1, keepdims=True)
    o = jax.lax.dot_general(e.astype(jnp.bfloat16), v, (((1,), (1,)), ((), ())),
                            preferred_element_type=jnp.float32)      # (tq, cv)
    o_ref[...] = (o * pl.reciprocal(denom, approx=True)).astype(o_ref.dtype)


def attention_pallas(q_cm, kv, ck):
    """q_cm: (B, ck, Nq) bf16, kv: (B, ck+cv, N) bf16 -> (B, Nq, cv) bf16."""
    B, _, Nq = q_cm.shape
    ckv, N = kv.shape[1], kv.shape[2]
    cv = ckv - ck
    tq = _spatial_tile(Nq, _TQ_TARGET)
    kern = functools.partial(_attn_kernel, ck=ck)
    # NOTE: the (tq, cv) output block is lane-sparse when cv < 128; a flat
    # (B, Nq*cv) lane-dense block would need an in-kernel (tq,cv)->(tq*cv,)
    # relayout which is kept off the critical "must compile" path here; bf16
    # stores halve the penalty and the HBM-side DMA of the block stays dense.
    return pl.pallas_call(
        kern,
        out_shape=jax.ShapeDtypeStruct((B, Nq, cv), jnp.bfloat16),
        grid=(B, pl.cdiv(Nq, tq)),
        in_specs=[
            pl.BlockSpec((None, ck, tq), lambda b, i: (b, 0, i)),
            _const_spec((None, ckv, N), lambda b, i: (b, 0, 0)),   # resident per batch
        ],
        out_specs=pl.BlockSpec((None, tq, cv), lambda b, i: (b, i, 0)),
        compiler_params=pltpu.CompilerParams(
            dimension_semantics=("parallel", "parallel"),
            vmem_limit_bytes=_VMEM_LIMIT,
        ),
    )(q_cm, kv)


# ----------------------------------------------------------------------------
# Final 1x1x1 conv on the `.view`-reinterpreted tensor + fused residual add.
# bf16 inputs, f32 accumulation, output directly in NCDHW-flat layout.
# ----------------------------------------------------------------------------
def _co_res_kernel(v_ref, w_ref, b_ref, r_ref, o_ref):
    # v: (cv, tn) bf16, w: (Cout, cv) bf16, b: (Cout, 1) f32, r: (Cout, tn) bf16
    o_ref[...] = (
        jnp.dot(w_ref[...], v_ref[...], preferred_element_type=jnp.float32)
        + b_ref[...]
        + r_ref[...].astype(jnp.float32)
    )


def co_residual_pallas(viewed, co_wT, co_b, residual):
    """viewed: (B, cv, Nq) bf16, co_wT: (Cout, cv) bf16, residual: (B, Cout, Nq) bf16."""
    B, cv, Nq = viewed.shape
    Cout = co_wT.shape[0]
    tn = _spatial_tile(Nq, _TN_EPI)
    return pl.pallas_call(
        _co_res_kernel,
        out_shape=jax.ShapeDtypeStruct((B, Cout, Nq), jnp.float32),
        grid=(B, pl.cdiv(Nq, tn)),
        in_specs=[
            pl.BlockSpec((None, cv, tn), lambda b, j: (b, 0, j)),
            _const_spec((Cout, cv), lambda b, j: (0, 0)),
            _const_spec((Cout, 1), lambda b, j: (0, 0)),
            pl.BlockSpec((None, Cout, tn), lambda b, j: (b, 0, j)),
        ],
        out_specs=pl.BlockSpec((None, Cout, tn), lambda b, j: (b, 0, j)),
        compiler_params=pltpu.CompilerParams(
            dimension_semantics=("parallel", "parallel"),
            vmem_limit_bytes=_VMEM_LIMIT,
        ),
    )(viewed, co_wT, co_b, residual)


# ----------------------------------------------------------------------------
# Parameter prep (one-time): fused channel-major weights, bf16 casts,
# 1/sqrt(ck) folded into the query deconv.
# ----------------------------------------------------------------------------
def prepare_params(params, ck, cv):
    c_in = params["k_w"].shape[0]
    c_out = params["co_w"].shape[1]
    scale = 1.0 / (ck ** 0.5)
    w_all = jnp.concatenate(
        [
            params["k_w"].T,                                   # (ck, Cin)
            params["v_w"].T,                                   # (cv, Cin)
            params["res_w"].reshape(c_in, c_out * 8).T,        # (8*Cout, Cin)
            (params["q_w"] * scale).reshape(c_in, ck * 8).T,   # (8*ck, Cin), pre-scaled
        ],
        axis=0,
    ).astype(jnp.bfloat16)
    b_all = jnp.concatenate(
        [
            params["k_b"],
            params["v_b"],
            jnp.repeat(params["res_b"], 8),
            jnp.repeat(params["q_b"], 8) * scale,
        ],
        axis=0,
    ).astype(jnp.float32).reshape(-1, 1)
    return dict(
        w_all=w_all,
        b_all=b_all,
        co_wT=params["co_w"].T.astype(jnp.bfloat16),           # (Cout, cv)
        co_b=params["co_b"].astype(jnp.float32).reshape(-1, 1),
    )


# ----------------------------------------------------------------------------
# Full forward
# ----------------------------------------------------------------------------
@functools.partial(jax.jit, static_argnames=("ck", "cv"))
def upsampling_agg_block(x, fused, ck, cv):
    B, Cin, D, H, W = x.shape
    N = D * H * W
    Nq = 8 * N
    Cout = fused["co_wT"].shape[0]

    # --- fused projection on native layout (no host transpose / pad of x)
    x3 = x.reshape(B, Cin, N)
    kv, res_pre, q_pre = fused_projection(x3, fused["w_all"], fused["b_all"], ck, cv, Cout)

    # --- ConvTranspose(k=2,s=2) interleave: one bf16 transpose each
    residual = (
        res_pre.reshape(B, Cout, 2, 2, 2, D, H, W)
        .transpose(0, 1, 5, 2, 6, 3, 7, 4)
        .reshape(B, Cout, Nq)
    )
    q_cm = (
        q_pre.reshape(B, ck, 2, 2, 2, D, H, W)
        .transpose(0, 1, 5, 2, 6, 3, 7, 4)
        .reshape(B, ck, Nq)
    )

    # --- query-tiled attention (dropout == identity)
    out2d = attention_pallas(q_cm, kv, ck)                     # (B, Nq, cv) bf16

    # torch `output.view(batch, cv, dq, hq, wq)` quirk: raw row-major
    # reinterpretation of the contiguous attention result (free reshape).
    viewed = out2d.reshape(B, cv, Nq)

    # --- final 1x1x1 conv (cv -> Cout) + residual, output directly in NCDHW
    out = co_residual_pallas(viewed, fused["co_wT"], fused["co_b"], residual)
    return out.reshape(B, Cout, 2 * D, 2 * H, 2 * W)


# ----------------------------------------------------------------------------
# Pure-JAX f32 reference (correctness check)
# ----------------------------------------------------------------------------
def reference_forward(x, params, ck, cv):
    B, Cin, D, H, W = x.shape

    def conv1x1_ref(x5, w, b):
        return jnp.einsum("bcdhw,cq->bqdhw", x5, w) + b[None, :, None, None, None]

    def deconv_ref(x5, w, b):
        y = jnp.einsum("bcdhw,cqijk->bqdihjwk", x5, w)
        Cq = w.shape[1]
        y = y.reshape(B, Cq, 2 * D, 2 * H, 2 * W)
        return y + b[None, :, None, None, None]

    N = D * H * W
    Nq = 8 * N
    residual = deconv_ref(x, params["res_w"], params["res_b"])
    q5 = deconv_ref(x, params["q_w"], params["q_b"])
    queries = q5.reshape(B, ck, Nq).transpose(0, 2, 1)
    keys = conv1x1_ref(x, params["k_w"], params["k_b"]).reshape(B, ck, N)
    values = conv1x1_ref(x, params["v_w"], params["v_b"]).reshape(B, cv, N)
    attn = jnp.einsum("bqc,bcn->bqn", queries, keys) / (ck**0.5)
    attn = jax.nn.softmax(attn, axis=-1)
    out = jnp.einsum("bqn,bnc->bqc", attn, values.transpose(0, 2, 1))
    out5 = out.reshape(B, cv, 2 * D, 2 * H, 2 * W)             # torch .view quirk
    out_co = conv1x1_ref(out5, params["co_w"], params["co_b"])
    return out_co + residual


# ----------------------------------------------------------------------------
# Deterministic parameter init
# ----------------------------------------------------------------------------
def init_params(key, c_in, c_out, ck, cv):
    ks = jax.random.split(key, 10)

    def w(k, shape, scale=0.1):
        return (jax.random.normal(k, shape) * scale).astype(jnp.float32)

    return dict(
        k_w=w(ks[0], (c_in, ck)),
        k_b=w(ks[1], (ck,)),
        v_w=w(ks[2], (c_in, cv)),
        v_b=w(ks[3], (cv,)),
        q_w=w(ks[4], (c_in, ck, 2, 2, 2)),
        q_b=w(ks[5], (ck,)),
        co_w=w(ks[6], (cv, c_out)),
        co_b=w(ks[7], (c_out,)),
        res_w=w(ks[8], (c_in, c_out, 2, 2, 2)),
        res_b=w(ks[9], (c_out,)),
    )


if __name__ == "__main__":
    B, Cin, Cout, ck, cv = 2, 4, 4, 8, 8
    D = H = W = 4

    key = jax.random.PRNGKey(0)
    kx, kp = jax.random.split(key)
    x = jax.random.normal(kx, (B, Cin, D, H, W), dtype=jnp.float32)
    params = init_params(kp, Cin, Cout, ck, cv)
    fused = prepare_params(params, ck, cv)

    out = upsampling_agg_block(x, fused, ck=ck, cv=cv)
    out = jax.block_until_ready(out)

    ref = reference_forward(x, params, ck, cv)
    assert out.shape == (B, Cout, 2 * D, 2 * H, 2 * W), out.shape
    # bf16 intermediates (kv / q / residual / attention output) + approx
    # reciprocal -> loosened tolerance vs the f32 reference
    assert jnp.allclose(out, ref, rtol=2e-2, atol=2e-2), float(
        jnp.max(jnp.abs(out - ref))
    )
    print("KERNEL_OK")
</pallas_src>

<mosaic_0001>
module attributes {stable_mosaic.version = 11 : i64} {
  func.func @_proj_kernel(%arg0: i32, %arg1: i32, %arg2: memref<1x4x64xf32, #tpu.memory_space<vmem>>, %arg3: memref<112x4xbf16, #tpu.memory_space<vmem>>, %arg4: memref<112x1xf32, #tpu.memory_space<vmem>>, %arg5: memref<1x16x64xbf16, #tpu.memory_space<vmem>>, %arg6: memref<1x32x64xbf16, #tpu.memory_space<vmem>>, %arg7: memref<1x64x64xbf16, #tpu.memory_space<vmem>>) attributes {dimension_semantics = [#tpu.dimension_semantics<parallel>, #tpu.dimension_semantics<parallel>], iteration_bounds = array<i64: 2, 1>, scalar_prefetch = 0 : i64, scratch_operands = 0 : i64, tpu.core_type = #tpu.core_type<tc>, window_params = [{transform_indices = @transform_0, window_bounds = array<i64: 1, 4, 64>}, {pipeline_mode = #tpu.pipeline_mode<synchronous>, transform_indices = @transform_1, window_bounds = array<i64: 112, 4>}, {pipeline_mode = #tpu.pipeline_mode<synchronous>, transform_indices = @transform_2, window_bounds = array<i64: 112, 1>}, {transform_indices = @transform_3, window_bounds = array<i64: 1, 16, 64>}, {transform_indices = @transform_4, window_bounds = array<i64: 1, 32, 64>}, {transform_indices = @transform_5, window_bounds = array<i64: 1, 64, 64>}]} {
    %c0 = arith.constant 0 : index
    %c0_0 = arith.constant 0 : index
    %0 = vector.load %arg3[%c0, %c0_0] : memref<112x4xbf16, #tpu.memory_space<vmem>>, vector<112x4xbf16>
    %c0_1 = arith.constant 0 : index
    %c0_2 = arith.constant 0 : index
    %c0_3 = arith.constant 0 : index
    %1 = vector.load %arg2[%c0_1, %c0_2, %c0_3] : memref<1x4x64xf32, #tpu.memory_space<vmem>>, vector<1x4x64xf32>
    %2 = vector.shape_cast %1 : vector<1x4x64xf32> to vector<4x64xf32>
    %3 = arith.truncf %2 : vector<4x64xf32> to vector<4x64xbf16>
    %cst = arith.constant dense<0.000000e+00> : vector<112x64xf32>
    %4 = tpu.matmul %0, %3, %cst {dimension_numbers = #tpu.dot_dimension_numbers<[1], [0], [0], [1], [0, 0, 1, 1], [], []>} : vector<112x4xbf16>, vector<4x64xbf16>, vector<112x64xf32> -> vector<112x64xf32>
    %c0_4 = arith.constant 0 : index
    %c0_5 = arith.constant 0 : index
    %5 = vector.load %arg4[%c0_4, %c0_5] : memref<112x1xf32, #tpu.memory_space<vmem>>, vector<112x1xf32>
    %6 = vector.broadcast %5 : vector<112x1xf32> to vector<112x64xf32>
    %7 = arith.addf %4, %6 : vector<112x64xf32>
    %8 = vector.extract_strided_slice %7 {offsets = [0, 0], sizes = [16, 64], strides = [1, 1]} : vector<112x64xf32> to vector<16x64xf32>
    %9 = arith.truncf %8 : vector<16x64xf32> to vector<16x64xbf16>
    %c0_6 = arith.constant 0 : index
    %c0_7 = arith.constant 0 : index
    %c0_8 = arith.constant 0 : index
    %10 = vector.load %arg5[%c0_6, %c0_7, %c0_8] : memref<1x16x64xbf16, #tpu.memory_space<vmem>>, vector<1x16x64xbf16>
    %11 = vector.shape_cast %10 : vector<1x16x64xbf16> to vector<16x64xbf16>
    %12 = vector.shape_cast %9 : vector<16x64xbf16> to vector<1x16x64xbf16>
    tpu.vector_store %arg5[%c0_6, %c0_7, %c0_8], %12 {strides = array<i32>} : memref<1x16x64xbf16, #tpu.memory_space<vmem>>, vector<1x16x64xbf16>,
    %13 = vector.extract_strided_slice %7 {offsets = [16, 0], sizes = [32, 64], strides = [1, 1]} : vector<112x64xf32> to vector<32x64xf32>
    %14 = arith.truncf %13 : vector<32x64xf32> to vector<32x64xbf16>
    %c0_9 = arith.constant 0 : index
    %c0_10 = arith.constant 0 : index
    %c0_11 = arith.constant 0 : index
    %15 = vector.load %arg6[%c0_9, %c0_10, %c0_11] : memref<1x32x64xbf16, #tpu.memory_space<vmem>>, vector<1x32x64xbf16>
    %16 = vector.shape_cast %15 : vector<1x32x64xbf16> to vector<32x64xbf16>
    %17 = vector.shape_cast %14 : vector<32x64xbf16> to vector<1x32x64xbf16>
    tpu.vector_store %arg6[%c0_9, %c0_10, %c0_11], %17 {strides = array<i32>} : memref<1x32x64xbf16, #tpu.memory_space<vmem>>, vector<1x32x64xbf16>,
    %18 = vector.extract_strided_slice %7 {offsets = [48, 0], sizes = [64, 64], strides = [1, 1]} : vector<112x64xf32> to vector<64x64xf32>
    %19 = arith.truncf %18 : vector<64x64xf32> to vector<64x64xbf16>
    %c0_12 = arith.constant 0 : index
    %c0_13 = arith.constant 0 : index
    %c0_14 = arith.constant 0 : index
    %20 = vector.load %arg7[%c0_12, %c0_13, %c0_14] : memref<1x64x64xbf16, #tpu.memory_space<vmem>>, vector<1x64x64xbf16>
    %21 = vector.shape_cast %20 : vector<1x64x64xbf16> to vector<64x64xbf16>
    %22 = vector.shape_cast %19 : vector<64x64xbf16> to vector<1x64x64xbf16>
    tpu.vector_store %arg7[%c0_12, %c0_13, %c0_14], %22 {strides = array<i32>} : memref<1x64x64xbf16, #tpu.memory_space<vmem>>, vector<1x64x64xbf16>,
    return
  }
  func.func @transform_0(%arg0: i32, %arg1: i32) -> (i32, i32, i32) {
    %c0_i32 = arith.constant 0 : i32
    %c0_i32_0 = arith.constant 0 : i32
    return %arg0, %c0_i32, %arg1 : i32, i32, i32
  }
  func.func @transform_1(%arg0: i32, %arg1: i32) -> (i32, i32) {
    %c0_i32 = arith.constant 0 : i32
    %c0_i32_0 = arith.constant 0 : i32
    %c0_i32_1 = arith.constant 0 : i32
    return %c0_i32, %c0_i32_0 : i32, i32
  }
  func.func @transform_2(%arg0: i32, %arg1: i32) -> (i32, i32) {
    %c0_i32 = arith.constant 0 : i32
    %c0_i32_0 = arith.constant 0 : i32
    %c0_i32_1 = arith.constant 0 : i32
    return %c0_i32, %c0_i32_0 : i32, i32
  }
  func.func @transform_3(%arg0: i32, %arg1: i32) -> (i32, i32, i32) {
    %c0_i32 = arith.constant 0 : i32
    %c0_i32_0 = arith.constant 0 : i32
    return %arg0, %c0_i32, %arg1 : i32, i32, i32
  }
  func.func @transform_4(%arg0: i32, %arg1: i32) -> (i32, i32, i32) {
    %c0_i32 = arith.constant 0 : i32
    %c0_i32_0 = arith.constant 0 : i32
    return %arg0, %c0_i32, %arg1 : i32, i32, i32
  }
  func.func @transform_5(%arg0: i32, %arg1: i32) -> (i32, i32, i32) {
    %c0_i32 = arith.constant 0 : i32
    %c0_i32_0 = arith.constant 0 : i32
    return %arg0, %c0_i32, %arg1 : i32, i32, i32
  }
}

module attributes {stable_mosaic.version = 11 : i64} {
  func.func @_attn_kernel(%arg0: i32, %arg1: i32, %arg2: memref<1x8x128xbf16, #tpu.memory_space<vmem>>, %arg3: memref<1x16x64xbf16, #tpu.memory_space<vmem>>, %arg4: memref<1x128x8xbf16, #tpu.memory_space<vmem>>) attributes {dimension_semantics = [#tpu.dimension_semantics<parallel>, #tpu.dimension_semantics<parallel>], iteration_bounds = array<i64: 2, 4>, scalar_prefetch = 0 : i64, scratch_operands = 0 : i64, tpu.core_type = #tpu.core_type<tc>, window_params = [{transform_indices = @transform_0, window_bounds = array<i64: 1, 8, 128>}, {pipeline_mode = #tpu.pipeline_mode<synchronous>, transform_indices = @transform_1, window_bounds = array<i64: 1, 16, 64>}, {transform_indices = @transform_2, window_bounds = array<i64: 1, 128, 8>}]} {
    %c0 = arith.constant 0 : index
    %c0_0 = arith.constant 0 : index
    %c0_1 = arith.constant 0 : index
    %0 = vector.load %arg3[%c0, %c0_0, %c0_1] : memref<1x16x64xbf16, #tpu.memory_space<vmem>>, vector<1x8x64xbf16>
    %1 = vector.shape_cast %0 : vector<1x8x64xbf16> to vector<8x64xbf16>
    %c0_2 = arith.constant 0 : index
    %c8 = arith.constant 8 : index
    %c0_3 = arith.constant 0 : index
    %2 = vector.load %arg3[%c0_2, %c8, %c0_3] : memref<1x16x64xbf16, #tpu.memory_space<vmem>>, vector<1x8x64xbf16>
    %3 = vector.shape_cast %2 : vector<1x8x64xbf16> to vector<8x64xbf16>
    %c0_4 = arith.constant 0 : index
    %c0_5 = arith.constant 0 : index
    %c0_6 = arith.constant 0 : index
    %4 = vector.load %arg2[%c0_4, %c0_5, %c0_6] : memref<1x8x128xbf16, #tpu.memory_space<vmem>>, vector<1x8x128xbf16>
    %5 = vector.shape_cast %4 : vector<1x8x128xbf16> to vector<8x128xbf16>
    %cst = arith.constant dense<0.000000e+00> : vector<128x64xf32>
    %6 = tpu.matmul %5, %1, %cst {dimension_numbers = #tpu.dot_dimension_numbers<[0], [0], [1], [1], [0, 1, 1, 1], [], []>} : vector<8x128xbf16>, vector<8x64xbf16>, vector<128x64xf32> -> vector<128x64xf32>
    %cst_7 = arith.constant dense<0xFF800000> : vector<128xf32>
    %7 = vector.multi_reduction <maximumf>, %6, %cst_7 [1] : vector<128x64xf32> to vector<128xf32>
    %8 = vector.shape_cast %7 : vector<128xf32> to vector<128x1xf32>
    %9 = vector.broadcast %8 : vector<128x1xf32> to vector<128x64xf32>
    %10 = arith.subf %6, %9 : vector<128x64xf32>
    %11 = math.exp %10 : vector<128x64xf32>
    %cst_8 = arith.constant dense<0.000000e+00> : vector<128xf32>
    %12 = vector.multi_reduction <add>, %11, %cst_8 [1] : vector<128x64xf32> to vector<128xf32>
    %13 = vector.shape_cast %12 : vector<128xf32> to vector<128x1xf32>
    %14 = arith.truncf %11 : vector<128x64xf32> to vector<128x64xbf16>
    %cst_9 = arith.constant dense<0.000000e+00> : vector<128x8xf32>
    %15 = tpu.matmul %14, %3, %cst_9 {dimension_numbers = #tpu.dot_dimension_numbers<[1], [1], [0], [0], [0, 0, 1, 0], [], []>} : vector<128x64xbf16>, vector<8x64xbf16>, vector<128x8xf32> -> vector<128x8xf32>
    %16 = tpu.reciprocal %13 {approx = true} : vector<128x1xf32> -> vector<128x1xf32>
    %17 = vector.broadcast %16 : vector<128x1xf32> to vector<128x8xf32>
    %18 = arith.mulf %15, %17 : vector<128x8xf32>
    %19 = arith.truncf %18 : vector<128x8xf32> to vector<128x8xbf16>
    %c0_10 = arith.constant 0 : index
    %c0_11 = arith.constant 0 : index
    %c0_12 = arith.constant 0 : index
    %20 = vector.load %arg4[%c0_10, %c0_11, %c0_12] : memref<1x128x8xbf16, #tpu.memory_space<vmem>>, vector<1x128x8xbf16>
    %21 = vector.shape_cast %20 : vector<1x128x8xbf16> to vector<128x8xbf16>
    %22 = vector.shape_cast %19 : vector<128x8xbf16> to vector<1x128x8xbf16>
    tpu.vector_store %arg4[%c0_10, %c0_11, %c0_12], %22 {strides = array<i32>} : memref<1x128x8xbf16, #tpu.memory_space<vmem>>, vector<1x128x8xbf16>,
    return
  }
  func.func @transform_0(%arg0: i32, %arg1: i32) -> (i32, i32, i32) {
    %c0_i32 = arith.constant 0 : i32
    %c0_i32_0 = arith.constant 0 : i32
    return %arg0, %c0_i32, %arg1 : i32, i32, i32
  }
  func.func @transform_1(%arg0: i32, %arg1: i32) -> (i32, i32, i32) {
    %c0_i32 = arith.constant 0 : i32
    %c0_i32_0 = arith.constant 0 : i32
    %c0_i32_1 = arith.constant 0 : i32
    return %arg0, %c0_i32, %c0_i32_0 : i32, i32, i32
  }
  func.func @transform_2(%arg0: i32, %arg1: i32) -> (i32, i32, i32) {
    %c0_i32 = arith.constant 0 : i32
    %c0_i32_0 = arith.constant 0 : i32
    return %arg0, %arg1, %c0_i32 : i32, i32, i32
  }
}

module attributes {stable_mosaic.version = 11 : i64} {
  func.func @_co_res_kernel(%arg0: i32, %arg1: i32, %arg2: memref<1x8x512xbf16, #tpu.memory_space<vmem>>, %arg3: memref<4x8xbf16, #tpu.memory_space<vmem>>, %arg4: memref<4x1xf32, #tpu.memory_space<vmem>>, %arg5: memref<1x4x512xbf16, #tpu.memory_space<vmem>>, %arg6: memref<1x4x512xf32, #tpu.memory_space<vmem>>) attributes {dimension_semantics = [#tpu.dimension_semantics<parallel>, #tpu.dimension_semantics<parallel>], iteration_bounds = array<i64: 2, 1>, scalar_prefetch = 0 : i64, scratch_operands = 0 : i64, tpu.core_type = #tpu.core_type<tc>, window_params = [{transform_indices = @transform_0, window_bounds = array<i64: 1, 8, 512>}, {pipeline_mode = #tpu.pipeline_mode<synchronous>, transform_indices = @transform_1, window_bounds = array<i64: 4, 8>}, {pipeline_mode = #tpu.pipeline_mode<synchronous>, transform_indices = @transform_2, window_bounds = array<i64: 4, 1>}, {transform_indices = @transform_3, window_bounds = array<i64: 1, 4, 512>}, {transform_indices = @transform_4, window_bounds = array<i64: 1, 4, 512>}]} {
    %c0 = arith.constant 0 : index
    %c0_0 = arith.constant 0 : index
    %0 = vector.load %arg3[%c0, %c0_0] : memref<4x8xbf16, #tpu.memory_space<vmem>>, vector<4x8xbf16>
    %c0_1 = arith.constant 0 : index
    %c0_2 = arith.constant 0 : index
    %c0_3 = arith.constant 0 : index
    %1 = vector.load %arg2[%c0_1, %c0_2, %c0_3] : memref<1x8x512xbf16, #tpu.memory_space<vmem>>, vector<1x8x512xbf16>
    %2 = vector.shape_cast %1 : vector<1x8x512xbf16> to vector<8x512xbf16>
    %cst = arith.constant dense<0.000000e+00> : vector<4x512xf32>
    %3 = tpu.matmul %0, %2, %cst {dimension_numbers = #tpu.dot_dimension_numbers<[1], [0], [0], [1], [0, 0, 1, 1], [], []>} : vector<4x8xbf16>, vector<8x512xbf16>, vector<4x512xf32> -> vector<4x512xf32>
    %c0_4 = arith.constant 0 : index
    %c0_5 = arith.constant 0 : index
    %4 = vector.load %arg4[%c0_4, %c0_5] : memref<4x1xf32, #tpu.memory_space<vmem>>, vector<4x1xf32>
    %5 = vector.broadcast %4 : vector<4x1xf32> to vector<4x512xf32>
    %6 = arith.addf %3, %5 : vector<4x512xf32>
    %c0_6 = arith.constant 0 : index
    %c0_7 = arith.constant 0 : index
    %c0_8 = arith.constant 0 : index
    %7 = vector.load %arg5[%c0_6, %c0_7, %c0_8] : memref<1x4x512xbf16, #tpu.memory_space<vmem>>, vector<1x4x512xbf16>
    %8 = vector.shape_cast %7 : vector<1x4x512xbf16> to vector<4x512xbf16>
    %9 = arith.extf %8 : vector<4x512xbf16> to vector<4x512xf32>
    %10 = arith.addf %6, %9 : vector<4x512xf32>
    %c0_9 = arith.constant 0 : index
    %c0_10 = arith.constant 0 : index
    %c0_11 = arith.constant 0 : index
    %11 = vector.load %arg6[%c0_9, %c0_10, %c0_11] : memref<1x4x512xf32, #tpu.memory_space<vmem>>, vector<1x4x512xf32>
    %12 = vector.shape_cast %11 : vector<1x4x512xf32> to vector<4x512xf32>
    %13 = vector.shape_cast %10 : vector<4x512xf32> to vector<1x4x512xf32>
    tpu.vector_store %arg6[%c0_9, %c0_10, %c0_11], %13 {strides = array<i32>} : memref<1x4x512xf32, #tpu.memory_space<vmem>>, vector<1x4x512xf32>,
    return
  }
  func.func @transform_0(%arg0: i32, %arg1: i32) -> (i32, i32, i32) {
    %c0_i32 = arith.constant 0 : i32
    %c0_i32_0 = arith.constant 0 : i32
    return %arg0, %c0_i32, %arg1 : i32, i32, i32
  }
  func.func @transform_1(%arg0: i32, %arg1: i32) -> (i32, i32) {
    %c0_i32 = arith.constant 0 : i32
    %c0_i32_0 = arith.constant 0 : i32
    %c0_i32_1 = arith.constant 0 : i32
    return %c0_i32, %c0_i32_0 : i32, i32
  }
  func.func @transform_2(%arg0: i32, %arg1: i32) -> (i32, i32) {
    %c0_i32 = arith.constant 0 : i32
    %c0_i32_0 = arith.constant 0 : i32
    %c0_i32_1 = arith.constant 0 : i32
    return %c0_i32, %c0_i32_0 : i32, i32
  }
  func.func @transform_3(%arg0: i32, %arg1: i32) -> (i32, i32, i32) {
    %c0_i32 = arith.constant 0 : i32
    %c0_i32_0 = arith.constant 0 : i32
    return %arg0, %c0_i32, %arg1 : i32, i32, i32
  }
  func.func @transform_4(%arg0: i32, %arg1: i32) -> (i32, i32, i32) {
    %c0_i32 = arith.constant 0 : i32
    %c0_i32_0 = arith.constant 0 : i32
    return %arg0, %c0_i32, %arg1 : i32, i32, i32
  }
}

</mosaic_0001>

<bundles_post_ra>
// kernel: upsampling_agg_block.3
= control target key start
LH: loop header
LB: loop body
LE: loop exit
PB: predicated region body
PF: predicated region fallthrough
CT: control target
= control target key end

     0   :  { %s982_s18 = smov 0   ;;  %s984_s19 = smov 0   ;;  %s1143_s0 = inlined_call_operand.vmem [shape: f32[2,4,64], index: 0, kind: input, shape index: {}]   ;;  %s1144_s1 = inlined_call_operand.vmem [shape: bf16[112,4], index: 1, kind: input, shape index: {}]   ;;  %s1145_s2 = inlined_call_operand.vmem [shape: f32[112,1], index: 2, kind: input, shape index: {}]   ;;  %s1146_s3 = inlined_call_operand.vmem [shape: bf16[2,16,64], index: 3, kind: output, shape index: {0}]   ;;  %s1147_s4 = inlined_call_operand.vmem [shape: bf16[2,32,64], index: 4, kind: output, shape index: {1}]   ;;  %s1148_s5 = inlined_call_operand.vmem [shape: bf16[2,64,64], index: 5, kind: output, shape index: {2}]  }
   0x1   :  { %s986_s20 = smov 0  }
   0x2 LB: > { %s28_s21 = sadd.s32 1, %s943_s19  ;;  %p794_p0 = scmp.ge.s32.totalorder %s947_s20, 1  ;;  %s947_s20 = sphi %s986_s20, %s16_s20   ;;  %s943_s19 = sphi %s984_s19, %s1150_s19   ;;  %s939_s18 = sphi %s982_s18, %s1149_s18  }
   0x3   : > { %p30_p1 = scmp.ge.s32.totalorder %s28_s21, 2  ;;  %p214_p2 = scmp.lt.s32.totalorder %s947_s20, 3 }
   0x5   : > { %s1152_s21 = smov (%p30_p1, %s28_s21), 0  ;;  %p215_p3 = pnand %p794_p0, %p214_p2 }
   0x6   : > { %p263_p4 = scmp.lt.s32.totalorder (!%p215_p3), %s939_s18, 1  ;;  %v949_v0 = vmov (!%p215_p3), 0.0   ;;  %vm950_vm0 = vmmov (!%p215_p3), 0   ;;  %v951_v1 = vmov (!%p215_p3), 0   ;;  %vm452_vm1 = vcmask (!%p215_p3), 1041408   ;;  %v313_v4 = vld [vmem:[%s1145_s2 + $0x10] sm:$0xff] (!%p215_p3) }
   0x7   : > { %218 = sbr.rel (%p215_p3) target bundleno = 267 (0x10b), region = 32  ;;  %857 = vmatprep.subr.bf16.mxu0 (!%p215_p3), %v949_v0  ;;  %887 = vmatprep.subr.bf16.mxu1 (!%p215_p3), %v949_v0  ;;  %v311_v5 = vld [vmem:[%s1145_s2] sm:$0xff] (!%p215_p3)  ;;  %vm430_vm2 = vcmask (!%p215_p3), 31744   ;;  %v314_v9 = vld [vmem:[%s1145_s2 + $0x18] sm:$0xff] (!%p215_p3)  ;;  %v312_v10 = vld [vmem:[%s1145_s2 + $0x8] sm:$0xff] (!%p215_p3)  ;;  %vm553_vm3 = vcmask (!%p215_p3), 519168  }
   0x8   : > { %859 = vmatprep.mubr.msk.bf16.mxu0 (!%p215_p3), %vm950_vm0, %v949_v0  ;;  %875 = vmatprep.mubr.msk.bf16.mxu1 (!%p215_p3), %vm950_vm0, %v949_v0  ;;  %v918_v7 = vld [vmem:[%s1144_s1] sm:$0xff] (!%p215_p3)   ;;  %v316_v11 = vld [vmem:[%s1145_s2 + $0x28] sm:$0xff] (!%p215_p3)  ;;  %v318_v15 = vld [vmem:[%s1145_s2 + $0x38] sm:$0xff] (!%p215_p3) }
   0x9   : > { %917 = vset.pattern.permute.xlu1 (!%p215_p3), %v951_v1  ;;  %916 = vset.pattern.permute.xlu0 (!%p215_p3), %v951_v1  ;;  %v919_v8 = vld [vmem:[%s1144_s1 + $0x20] sm:$0xff] (!%p215_p3)   ;;  %v920_v13 = vld [vmem:[%s1144_s1 + $0x8] sm:$0xff] (!%p215_p3)   ;;  %v317_v16 = vld [vmem:[%s1145_s2 + $0x30] sm:$0xff] (!%p215_p3) }
   0xa   : > { %337 = vperm.xlu1 (!%p215_p3), %917, %v313_v4   ;;  %327 = vperm.xlu0 (!%p215_p3), %916, %v311_v5   ;;  %v315_v12 = vld [vmem:[%s1145_s2 + $0x20] sm:$0xff] (!%p215_p3)  ;;  %v921_v14 = vld [vmem:[%s1144_s1 + $0x28] sm:$0xff] (!%p215_p3)   ;;  %v922_v19 = vld [vmem:[%s1144_s1 + $0x10] sm:$0xff] (!%p215_p3)  }
   0xb   : > { %v320_v17 = vld [vmem:[%s1145_s2 + $0x48] sm:$0xff] (!%p215_p3)  ;;  %v319_v18 = vld [vmem:[%s1145_s2 + $0x40] sm:$0xff] (!%p215_p3)  ;;  %v923_v20 = vld [vmem:[%s1144_s1 + $0x30] sm:$0xff] (!%p215_p3)  }
   0xc   : > { %v322_v21 = vld [vmem:[%s1145_s2 + $0x58] sm:$0xff] (!%p215_p3)  ;;  %v321_v22 = vld [vmem:[%s1145_s2 + $0x50] sm:$0xff] (!%p215_p3)  ;;  %v324_v23 = vld [vmem:[%s1145_s2 + $0x68] sm:$0xff] (!%p215_p3) }
   0xd   : > { %v323_v24 = vld [vmem:[%s1145_s2 + $0x60] sm:$0xff] (!%p215_p3)  ;;  %v924_v25 = vld [vmem:[%s1144_s1 + $0x18] sm:$0xff] (!%p215_p3)  }
   0xe   : > { %s1154_s18 = smov (!%p263_p4, %s939_s18), 1  ;;  %342 = vperm.xlu1 %917, %v314_v9   ;;  %332 = vperm.xlu0 %916, %v312_v10  }
   0xf   : > { %s795_s22 = sshll.u32 %s1154_s18, 2  ;;  %s834_s26 = sshll.u32 %s1154_s18, 5 }
  0x10   : > { %s269_s25 = scalar_lea.vmem %s1143_s0, %s795_s22  ;;  %s832_s27 = sshll.u32 %s1154_s18, 3 }
  0x11   : > { %v309_v2 = vld [vmem:[%s269_s25] sm:$0xf]  ;;  %s1094_s30 = scalar_lea.vmem %s1148_s5, %s834_s26  ;;  %s277_s8 = scalar_lea.vmem %s1146_s3, %s832_s27 }
  0x12   : > { %v310_v3 = vpack.c.bf16 %v309_v2, %v309_v2  ;;  %352 = vperm.xlu1 %917, %v316_v11   ;;  %347 = vperm.xlu0 %916, %v315_v12   ;;  %s833_s9 = sshll.u32 %s1154_s18, 4 }
  0x13   : > { %s1109_s12 = scalar_lea.vmem %s1147_s4, %s833_s9 }
  0x14   : > { %v454_v6 = vsel %vm452_vm1, %v310_v3, 0 }
  0x15   : > { %858 = vmatpush3.bf16.msra.mxu0 %v454_v6  ;;  %888 = vmatpush3.bf16.msra.mxu1 %v454_v6 }
  0x16   : > { %362 = vperm.xlu1 %917, %v318_v15   ;;  %357 = vperm.xlu0 %916, %v317_v16  }
  0x18   : > { %860 = vmatmul.mubr.msk.bf16.vlgmr.msra.gmra.mrb[0].mxu0 %vm430_vm2, %v918_v7  ;;  %876 = vmatmul.mubr.msk.bf16.vlgmr.msra.gmra.mrb[0].mxu1 %vm430_vm2, %v919_v8 }
  0x19   : > { %863 = vmatprep.mubr.msk.bf16.mxu0 %vm950_vm0, %v949_v0  ;;  %879 = vmatprep.mubr.msk.bf16.mxu1 %vm950_vm0, %v949_v0 }
  0x1a   : > { %372 = vperm.xlu1 %917, %v320_v17   ;;  %367 = vperm.xlu0 %916, %v319_v18  }
  0x1e   : > { %382 = vperm.xlu1 %917, %v322_v21   ;;  %377 = vperm.xlu0 %916, %v321_v22  }
  0x20   : > { %864 = vmatmul.mubr.msk.bf16.gmra.mrb[4].mxu0 %vm430_vm2, %v920_v13  ;;  %880 = vmatmul.mubr.msk.bf16.gmra.mrb[4].mxu1 %vm430_vm2, %v921_v14 }
  0x21   : > { %867 = vmatprep.mubr.msk.bf16.mxu0 %vm950_vm0, %v949_v0  ;;  %883 = vmatprep.mubr.msk.bf16.mxu1 %vm950_vm0, %v949_v0 }
  0x22   : > { %392 = vperm.xlu1 %917, %v324_v23   ;;  %387 = vperm.xlu0 %916, %v323_v24  }
  0x28   : > { %868 = vmatmul.mubr.msk.bf16.gmra.mrb[8].mxu0 %vm430_vm2, %v922_v19  ;;  %884 = vmatmul.mubr.msk.bf16.gmra.mrb[8].mxu1 %vm430_vm2, %v923_v20 }
  0x29   : > { %871 = vmatprep.mubr.msk.bf16.mxu0 %vm950_vm0, %v949_v0 }
  0x30   : > { %872 = vmatmul.mubr.msk.bf16.gmra.mrb[12].mxu0 %vm430_vm2, %v924_v25 }
  0x89   : > { %v338_v26 = vpop.permute.xlu1 %337  ;;  %v328_v27 = vpop.permute.xlu0 %327 }
  0x8d   : > { %v343_v28 = vpop.permute.xlu1 %342  ;;  %v333_v29 = vpop.permute.xlu0 %332 }
  0x91   : > { %v1083_v30 = vpop.permute.xlu1 %352  ;;  %v348_v31 = vpop.permute.xlu0 %347 }
  0x95   : > { %v1085_v32 = vpop.permute.xlu1 %362  ;;  %v1087_v33 = vpop.permute.xlu0 %357 }
  0x99   : > { %v373_v34 = vpop.permute.xlu1 %372  ;;  %v368_v35 = vpop.permute.xlu0 %367 }
  0x9d   : > { %v383_v52 = vpop.permute.xlu1 %382  ;;  %v378_v53 = vpop.permute.xlu0 %377 }
  0xa1   : > { %v393_v6 = vpop.permute.xlu1 %392  ;;  %v388_v7 = vpop.permute.xlu0 %387 }
  0xeb   : > { %v490_v36 = vpop.f32.mrb[0].mxu0  ;;  %v522_v37 = vpop.f32.mrb[0].mxu1 }
  0xec   : > { %v491_v38 = vadd.f32 %v490_v36, %v328_v27  ;;  %v523_v39 = vadd.f32 %v522_v37, %v368_v35  ;;  %v861_v40 = vpop.f32.mrb[1].mxu0  ;;  %v877_v41 = vpop.f32.mrb[1].mxu1 }
  0xed   : > { %v493_v42 = vpop.f32.mrb[2].mxu0  ;;  %v525_v43 = vpop.f32.mrb[2].mxu1 }
  0xee   : > { %v835_v44 = vpack.c.bf16 %v491_v38, %v491_v38  ;;  %v843_v45 = vpack.c.bf16 %v523_v39, %v523_v39  ;;  %v494_v46 = vadd.f32 %v493_v42, %v333_v29  ;;  %v526_v47 = vadd.f32 %v525_v43, %v373_v34  ;;  %v862_v48 = vpop.f32.mrb[3].mxu0  ;;  %v878_v49 = vpop.f32.mrb[3].mxu1 }
  0xf0   : > { %554 = vst.msk [vmem:[%s277_s8] sm:$0xf] %vm553_vm3, %v835_v44  ;;  %610 = vst.msk [vmem:[%s1094_s30 + $0x8] sm:$0xf] %vm553_vm3, %v843_v45  ;;  %v836_v50 = vpack.c.bf16 %v494_v46, %v494_v46  ;;  %v844_v51 = vpack.c.bf16 %v526_v47, %v526_v47 }
  0xf2   : > { %555 = vst.msk [vmem:[%s277_s8 + $0x4] sm:$0xf] %vm553_vm3, %v836_v50  ;;  %611 = vst.msk [vmem:[%s1094_s30 + $0xc] sm:$0xf] %vm553_vm3, %v844_v51 }
  0xf3   : > { %v498_v54 = vpop.f32.mrb[4].mxu0  ;;  %v530_v55 = vpop.f32.mrb[4].mxu1 }
  0xf4   : > { %v499_v56 = vadd.f32 %v498_v54, %v338_v26  ;;  %v531_v57 = vadd.f32 %v530_v55, %v378_v53  ;;  %v865_v58 = vpop.f32.mrb[5].mxu0  ;;  %v881_v59 = vpop.f32.mrb[5].mxu1 }
  0xf5   : > { %v501_v60 = vpop.f32.mrb[6].mxu0  ;;  %v533_v61 = vpop.f32.mrb[6].mxu1 }
  0xf6   : > { %v837_v62 = vpack.c.bf16 %v499_v56, %v499_v56  ;;  %v845_v63 = vpack.c.bf16 %v531_v57, %v531_v57  ;;  %v502_v0 = vadd.f32 %v501_v60, %v343_v28  ;;  %v534_v1 = vadd.f32 %v533_v61, %v383_v52  ;;  %v866_v2 = vpop.f32.mrb[7].mxu0  ;;  %v882_v3 = vpop.f32.mrb[7].mxu1 }
  0xf8   : > { %572 = vst.msk [vmem:[%s1109_s12] sm:$0xf] %vm553_vm3, %v837_v62  ;;  %612 = vst.msk [vmem:[%s1094_s30 + $0x10] sm:$0xf] %vm553_vm3, %v845_v63  ;;  %v838_v4 = vpack.c.bf16 %v502_v0, %v502_v0  ;;  %v846_v5 = vpack.c.bf16 %v534_v1, %v534_v1 }
  0xfa   : > { %573 = vst.msk [vmem:[%s1109_s12 + $0x4] sm:$0xf] %vm553_vm3, %v838_v4  ;;  %613 = vst.msk [vmem:[%s1094_s30 + $0x14] sm:$0xf] %vm553_vm3, %v846_v5 }
  0xfb   : > { %v506_v8 = vpop.f32.mrb[8].mxu0  ;;  %v538_v9 = vpop.f32.mrb[8].mxu1 }
  0xfc   : > { %v507_v10 = vadd.f32 %v506_v8, %v348_v31  ;;  %v539_v11 = vadd.f32 %v538_v9, %v388_v7  ;;  %v869_v12 = vpop.f32.mrb[9].mxu0  ;;  %v885_v13 = vpop.f32.mrb[9].mxu1 }
  0xfd   : > { %v509_v14 = vpop.f32.mrb[10].mxu0  ;;  %v541_v15 = vpop.f32.mrb[10].mxu1 }
  0xfe   : > { %v839_v16 = vpack.c.bf16 %v507_v10, %v507_v10  ;;  %v847_v17 = vpack.c.bf16 %v539_v11, %v539_v11  ;;  %v510_v18 = vadd.f32 %v509_v14, %v1083_v30  ;;  %v542_v19 = vadd.f32 %v541_v15, %v393_v6  ;;  %v870_v20 = vpop.f32.mrb[11].mxu0  ;;  %v886_v21 = vpop.f32.mrb[11].mxu1 }
 0x100   : > { %574 = vst.msk [vmem:[%s1109_s12 + $0x8] sm:$0xf] %vm553_vm3, %v839_v16  ;;  %614 = vst.msk [vmem:[%s1094_s30 + $0x18] sm:$0xf] %vm553_vm3, %v847_v17  ;;  %v840_v22 = vpack.c.bf16 %v510_v18, %v510_v18  ;;  %v848_v23 = vpack.c.bf16 %v542_v19, %v542_v19 }
 0x102   : > { %575 = vst.msk [vmem:[%s1109_s12 + $0xc] sm:$0xf] %vm553_vm3, %v840_v22  ;;  %615 = vst.msk [vmem:[%s1094_s30 + $0x1c] sm:$0xf] %vm553_vm3, %v848_v23 }
 0x103   : > { %v514_v24 = vpop.f32.mrb[12].mxu0 }
 0x104   : > { %v515_v25 = vadd.f32 %v514_v24, %v1087_v33  ;;  %v873_v26 = vpop.f32.mrb[13].mxu0 }
 0x105   : > { %v517_v27 = vpop.f32.mrb[14].mxu0 }
 0x106   : > { %v841_v28 = vpack.c.bf16 %v515_v25, %v515_v25  ;;  %v518_v29 = vadd.f32 %v517_v27, %v1085_v32  ;;  %v874_v30 = vpop.f32.mrb[15].mxu0 }
 0x108   : > { %608 = vst.msk [vmem:[%s1094_s30] sm:$0xf] %vm553_vm3, %v841_v28  ;;  %v842_v31 = vpack.c.bf16 %v518_v29, %v518_v29 }
 0x10a   : > { %609 = vst.msk [vmem:[%s1094_s30 + $0x4] sm:$0xf] %vm553_vm3, %v842_v31 }
 0x10b PF: > { %s16_s20 = sadd.s32 1, %s947_s20   ;;  %s1149_s18 = smov %s943_s19 }
 0x10c   : > { %p13_p5 = scmp.ge.s32.totalorder %s16_s20, 4   ;;  %s1150_s19 = smov %s1152_s21 }
 0x10e   :  { %15 = sbr.rel (!%p13_p5) target bundleno = 2 (0x2), region = 86 }

// kernel: upsampling_agg_block.4
= control target key start
LH: loop header
LB: loop body
LE: loop exit
PB: predicated region body
PF: predicated region fallthrough
CT: control target
= control target key end

     0   :  { %s1118_s9 = smov 0   ;;  %s1120_s10 = smov 0   ;;  %s1314_s0 = inlined_call_operand.vmem [shape: bf16[2,8,512], index: 0, kind: input, shape index: {}]   ;;  %s1315_s1 = inlined_call_operand.vmem [shape: bf16[2,16,64], index: 1, kind: input, shape index: {}]   ;;  %s1316_s2 = inlined_call_operand.vmem [shape: bf16[2,512,8], index: 2, kind: output, shape index: {}]  }
   0x1   :  { %s1122_s11 = smov 0   ;;  %s1124_s12 = smov 0  }
   0x2   :  { %s1126_s13 = smov 0  }
   0x3 LB: > { %s21_s14 = sadd.s32 1, %s1093_s11  ;;  %s24_s15 = sadd.s32 1, %s1097_s12  ;;  %s1101_s13 = sphi %s1126_s13, %s12_s13   ;;  %s1097_s12 = sphi %s1124_s12, %s1320_s12   ;;  %s1093_s11 = sphi %s1122_s11, %s1319_s11   ;;  %s1089_s10 = sphi %s1120_s10, %s1318_s10   ;;  %s1085_s9 = sphi %s1118_s9, %s1317_s9  }
   0x4   : > { %p22_p0 = scmp.ge.s32.totalorder %s21_s14, 4  ;;  %p843_p1 = scmp.ge.s32.totalorder %s1101_s13, 1 }
   0x5   : > { %p141_p2 = scmp.lt.s32.totalorder %s1101_s13, 9 }
   0x6   : > { %s1322_s14 = smov (%p22_p0, %s21_s14), 0  ;;  %s1324_s15 = smov (!%p22_p0, %s24_s15), %s1097_s12 }
   0x7   : > { %p142_p3 = pnand %p843_p1, %p141_p2  ;;  %p26_p4 = scmp.ge.s32.totalorder %s1324_s15, 2 }
   0x8   : > { %p175_p5 = scmp.lt.s32.totalorder (!%p142_p3), %s1089_s10, 1  ;;  %p177_p6 = scmp.lt.s32.totalorder (!%p142_p3), %s1085_s9, 3  ;;  %vm243_vm0 = vcmask (!%p142_p3), 1043456   ;;  %vm218_vm1 = vcmask (!%p142_p3), 64512   ;;  %vm344_vm2 = vcmask (!%p142_p3), 523264   ;;  %vm717_vm3 = vcmask (!%p142_p3), 60416  }
   0x9   : > { %s1326_s15 = smov (%p26_p4, %s1324_s15), 0  ;;  %145 = sbr.rel (%p142_p3) target bundleno = 770 (0x302), region = 28 }
   0xa   : > { %s848_s27 = sshll.u32 (!%p142_p3), %s1085_s9, 4 }
   0xb   : > { %p191_p7 = scmp.lt.s32.totalorder (!%p142_p3), %s848_s27, 63 }
  0x10   : > { %s1328_s10 = smov (!%p175_p5, %s1089_s10), 1  ;;  %s1330_s27 = smov (!%p191_p7, %s848_s27), 63 }
  0x11   : > { %s178_s16 = scalar_select %p177_p6, %s1085_s9, 3 }
  0x12   : > { %s844_s17 = sshll.u32 %s1328_s10, 2  ;;  %s885_s20 = sshll.u32 %s1328_s10, 3 }
  0x13   : > { %s180_s18 = sadd.s32 %s844_s17, %s178_s16  ;;  %s1162_s26 = scalar_lea.vmem %s1315_s1, %s885_s20 }
  0x14   : > { %s845_s19 = sshll.u32 %s180_s18, 2  ;;  %v199_v1 = vld [vmem:[%s1162_s26] sm:$0xf]  ;;  %v200_v39 = vld [vmem:[%s1162_s26 + $0x4] sm:$0xf]  ;;  %s849_s28 = sshll.u32 %s1328_s10, 6 }
  0x15   : > { %s182_s23 = scalar_lea.vmem %s1314_s0, %s845_s19  ;;  %956 = vmatprep.subr.msk.bf16.mxu0 %vm243_vm0, %v199_v1  ;;  %v245_v2 = vsel %vm243_vm0, %v199_v1, 0  ;;  %957 = vmatprep.subr.msk.bf16.mxu1 %vm344_vm2, %v200_v39  ;;  %v522_v40 = vsel %vm344_vm2, %v200_v39, 0  ;;  %s194_s29 = sadd.s32 %s849_s28, %s1330_s27 }
  0x16   : > { %v201_v0 = vld [vmem:[%s182_s23] sm:$0xf]  ;;  %921 = vmatpush3.bf16.msra.mxu0 %v245_v2  ;;  %939 = vmatpush3.bf16.xpose.msra.mxu1 %v522_v40  ;;  %s850_s30 = sshll.u32 %s194_s29, 2 }
  0x17   : > { %202 = vxpose.xlu0.c.b16.start.end [1/1] (short) %v201_v0, 128  ;;  %s1265_s5 = scalar_lea.vmem %s1316_s2, %s850_s30 }
  0x7d   : > { %v210_v3 = vpop.trf.xlu0 }
  0x7e   : > { %922 = vmatprep.mubr.msk.bf16.mxu0 %vm218_vm1, %v210_v3 }
  0x81   : > { %v211_v4 = vpop.trf.xlu0 }
  0x82   : > { %923 = vmatmul.mubr.msk.bf16.vlgmr.msra.gmra.mrb[0].mxu0 %vm218_vm1, %v211_v4 }
  0x85   : > { %v212_v5 = vpop.trf.xlu0 }
  0x86   : > { %926 = vmatprep.mubr.msk.bf16.mxu0 %vm218_vm1, %v212_v5 }
  0x89   : > { %v213_v6 = vpop.trf.xlu0 }
  0x8a   : > { %927 = vmatmul.mubr.msk.bf16.gmra.mrb[4].mxu0 %vm218_vm1, %v213_v6 }
  0x8d   : > { %v214_v7 = vpop.trf.xlu0 }
  0x8e   : > { %930 = vmatprep.mubr.msk.bf16.mxu0 %vm218_vm1, %v214_v7 }
  0x91   : > { %v215_v8 = vpop.trf.xlu0 }
  0x92   : > { %931 = vmatmul.mubr.msk.bf16.gmra.mrb[8].mxu0 %vm218_vm1, %v215_v8 }
  0x95   : > { %v216_v9 = vpop.trf.xlu0 }
  0x96   : > { %934 = vmatprep.mubr.msk.bf16.mxu0 %vm218_vm1, %v216_v9 }
  0x99   : > { %v217_v10 = vpop.trf.xlu0 }
  0x9a   : > { %935 = vmatmul.mubr.msk.bf16.gmra.mrb[12].mxu0 %vm218_vm1, %v217_v10 }
 0x155   : > { %v924_v11 = vpop.f32.mrb[0].mxu0 }
 0x156   : > { %v281_v12 = vpop.f32.mrb[1].mxu0  ;;  %v351_v13 = vsel %vm344_vm2, %v924_v11, -inf }
 0x157   : > { %352 = vmax.xlane.f32.xlu1 %v351_v13  ;;  %v925_v14 = vpop.f32.mrb[2].mxu0  ;;  %v345_v15 = vsel %vm344_vm2, %v281_v12, -inf }
 0x158   : > { %346 = vmax.xlane.f32.xlu0 %v345_v15  ;;  %v284_v16 = vpop.f32.mrb[3].mxu0  ;;  %v354_v17 = vsel %vm344_vm2, %v925_v14, -inf }
 0x159   : > { %v348_v19 = vsel %vm344_vm2, %v284_v16, -inf }
 0x15b   : > { %355 = vmax.xlane.f32.xlu1 %v354_v17 }
 0x15d   : > { %v928_v18 = vpop.f32.mrb[4].mxu0 }
 0x15e   : > { %v1177_v20 = vpop.f32.mrb[5].mxu0  ;;  %v363_v23 = vsel %vm344_vm2, %v928_v18, -inf }
 0x15f   : > { %349 = vmax.xlane.f32.xlu1 %v348_v19  ;;  %v1179_v21 = vpop.f32.mrb[6].mxu0  ;;  %v357_v25 = vsel %vm344_vm2, %v1177_v20, -inf }
 0x160   : > { %v1181_v22 = vpop.f32.mrb[7].mxu0  ;;  %v366_v29 = vsel %vm344_vm2, %v1179_v21, -inf }
 0x161   : > { %v360_v32 = vsel %vm344_vm2, %v1181_v22, -inf }
 0x163   : > { %364 = vmax.xlane.f32.xlu1 %v363_v23 }
 0x165   : > { %v1184_v24 = vpop.f32.mrb[8].mxu0 }
 0x166   : > { %v1188_v26 = vpop.f32.mrb[9].mxu0  ;;  %v375_v35 = vsel %vm344_vm2, %v1184_v24, -inf }
 0x167   : > { %358 = vmax.xlane.f32.xlu1 %v357_v25  ;;  %v1190_v27 = vpop.f32.mrb[10].mxu0  ;;  %v369_v38 = vsel %vm344_vm2, %v1188_v26, -inf }
 0x168   : > { %v1192_v28 = vpop.f32.mrb[11].mxu0  ;;  %v378_v42 = vsel %vm344_vm2, %v1190_v27, -inf }
 0x169   : > { %v372_v41 = vsel %vm344_vm2, %v1192_v28, -inf }
 0x16b   : > { %367 = vmax.xlane.f32.xlu1 %v366_v29 }
 0x16d   : > { %v1196_v30 = vpop.f32.mrb[12].mxu0 }
 0x16e   : > { %v1198_v31 = vpop.f32.mrb[13].mxu0  ;;  %v387_v44 = vsel %vm344_vm2, %v1196_v30, -inf }
 0x16f   : > { %361 = vmax.xlane.f32.xlu1 %v360_v32  ;;  %v1202_v33 = vpop.f32.mrb[14].mxu0  ;;  %v381_v43 = vsel %vm344_vm2, %v1198_v31, -inf }
 0x170   : > { %v1204_v34 = vpop.f32.mrb[15].mxu0  ;;  %v390_v37 = vsel %vm344_vm2, %v1202_v33, -inf }
 0x171   : > { %v384_v36 = vsel %vm344_vm2, %v1204_v34, -inf }
 0x172   : > { %385 = vmax.xlane.f32.xlu0 %v384_v36 }
 0x173   : > { %376 = vmax.xlane.f32.xlu1 %v375_v35 }
 0x176   : > { %391 = vmax.xlane.f32.xlu0 %v390_v37 }
 0x177   : > { %370 = vmax.xlane.f32.xlu1 %v369_v38 }
 0x17b   : > { %373 = vmax.xlane.f32.xlu1 %v372_v41 }
 0x17f   : > { %379 = vmax.xlane.f32.xlu1 %v378_v42 }
 0x183   : > { %382 = vmax.xlane.f32.xlu1 %v381_v43 }
 0x187   : > { %388 = vmax.xlane.f32.xlu1 %v387_v44 }
 0x1e4   : > { %v353_v45 = vpop.xlane.xlu1 %352 }
 0x1e5   : > { %v395_v46 = vsub.f32 %v924_v11, %v353_v45  ;;  %v347_v47 = vpop.xlane.xlu0 %346 }
 0x1e6   : > { %v393_v48 = vsub.f32 %v281_v12, %v347_v47 }
 0x1e7   : > { %v413_v49 = vmul.f32 1.442695, %v395_v46 }
 0x1e8   : > { %v409_v50 = vmul.f32 1.442695, %v393_v48  ;;  %v356_v51 = vpop.xlane.xlu1 %355 }
 0x1e9   : > { %999 = vpow2.f32 %v413_v49  ;;  %v396_v52 = vsub.f32 %v925_v14, %v356_v51 }
 0x1ea   : > { %1001 = vpow2.f32 %v409_v50 }
 0x1eb   : > { %v415_v53 = vmul.f32 1.442695, %v396_v52 }
 0x1ec   : > { %v350_v54 = vpop.xlane.xlu1 %349 }
 0x1ed   : > { %1003 = vpow2.f32 %v415_v53  ;;  %v394_v55 = vsub.f32 %v284_v16, %v350_v54 }
 0x1ef   : > { %v411_v56 = vmul.f32 1.442695, %v394_v55 }
 0x1f0   : > { %v365_v57 = vpop.xlane.xlu1 %364 }
 0x1f1   : > { %1005 = vpow2.f32 %v411_v56  ;;  %v399_v58 = vsub.f32 %v928_v18, %v365_v57 }
 0x1f3   : > { %v1000_v59 = vpop.eup %999  ;;  %v421_v60 = vmul.f32 1.442695, %v399_v58 }
 0x1f4   : > { %v359_v61 = vpop.xlane.xlu1 %358  ;;  %v447_v62 = vsel %vm344_vm2, %v1000_v59, 0.0  ;;  %v1002_v63 = vpop.eup %1001 }
 0x1f5   : > { %1007 = vpow2.f32 %v421_v60  ;;  %v397_v0 = vsub.f32 %v1177_v20, %v359_v61  ;;  %448 = vadd.xlane.f32.xlu1 %v447_v62  ;;  %v441_v5 = vsel %vm344_vm2, %v1002_v63, 0.0 }
 0x1f7   : > { %v1004_v1 = vpop.eup %1003  ;;  %v417_v2 = vmul.f32 1.442695, %v397_v0 }
 0x1f8   : > { %v368_v3 = vpop.xlane.xlu1 %367  ;;  %v450_v4 = vsel %vm344_vm2, %v1004_v1, 0.0  ;;  %v490_v6 = vpack.c.bf16 %v1004_v1, %v1000_v59 }
 0x1f9   : > { %1009 = vpow2.f32 %v417_v2  ;;  %v400_v7 = vsub.f32 %v1179_v21, %v368_v3  ;;  %451 = vadd.xlane.f32.xlu0 %v450_v4  ;;  %442 = vadd.xlane.f32.xlu1 %v441_v5 }
 0x1fb   : > { %v1006_v8 = vpop.eup %1005  ;;  %v423_v9 = vmul.f32 1.442695, %v400_v7 }
 0x1fc   : > { %v362_v10 = vpop.xlane.xlu1 %361  ;;  %v444_v11 = vsel %vm344_vm2, %v1006_v8, 0.0  ;;  %v489_v12 = vpack.c.bf16 %v1006_v8, %v1002_v63 }
 0x1fd   : > { %1011 = vpow2.f32 %v423_v9  ;;  %v398_v13 = vsub.f32 %v1181_v22, %v362_v10  ;;  %445 = vadd.xlane.f32.xlu0 %v444_v11 }
 0x1fe   : > { %940 = vmatprep.mubr.msk.bf16.mxu1 %vm344_vm2, %v489_v12 }
 0x1ff   : > { %v1008_v14 = vpop.eup %1007  ;;  %v419_v15 = vmul.f32 1.442695, %v398_v13  ;;  %941 = vmatmul.mubr.msk.bf16.vlgmr.msra.gmra.mrb[0].mxu1 %vm344_vm2, %v490_v6  ;;  %v386_v29 = vpop.xlane.xlu0 %385 }
 0x200   : > { %v377_v16 = vpop.xlane.xlu1 %376  ;;  %v459_v17 = vsel %vm344_vm2, %v1008_v14, 0.0  ;;  %v406_v40 = vsub.f32 %v1204_v34, %v386_v29 }
 0x201   : > { %1013 = vpow2.f32 %v419_v15  ;;  %v403_v18 = vsub.f32 %v1184_v24, %v377_v16  ;;  %460 = vadd.xlane.f32.xlu1 %v459_v17 }
 0x203   : > { %v1010_v19 = vpop.eup %1009  ;;  %v429_v20 = vmul.f32 1.442695, %v403_v18  ;;  %v392_v43 = vpop.xlane.xlu0 %391 }
 0x204   : > { %v371_v21 = vpop.xlane.xlu1 %370  ;;  %v453_v23 = vsel %vm344_vm2, %v1010_v19, 0.0  ;;  %v408_v47 = vsub.f32 %v1202_v33, %v392_v43 }
 0x205   : > { %1015 = vpow2.f32 %v429_v20  ;;  %v401_v22 = vsub.f32 %v1188_v26, %v371_v21  ;;  %454 = vadd.xlane.f32.xlu1 %v453_v23 }
 0x207   : > { %v1012_v25 = vpop.eup %1011  ;;  %v425_v32 = vmul.f32 1.442695, %v401_v22 }
 0x208   : > { %v374_v35 = vpop.xlane.xlu1 %373  ;;  %v462_v36 = vsel %vm344_vm2, %v1012_v25, 0.0  ;;  %v492_v37 = vpack.c.bf16 %v1012_v25, %v1008_v14 }
 0x209   : > { %1017 = vpow2.f32 %v425_v32  ;;  %v402_v24 = vsub.f32 %v1192_v28, %v374_v35  ;;  %463 = vadd.xlane.f32.xlu0 %v462_v36  ;;  %v435_v28 = vmul.f32 1.442695, %v406_v40 }
 0x20b   : > { %v1014_v38 = vpop.eup %1013  ;;  %v427_v39 = vmul.f32 1.442695, %v402_v24 }
 0x20c   : > { %v380_v41 = vpop.xlane.xlu1 %379  ;;  %v456_v42 = vsel %vm344_vm2, %v1014_v38, 0.0  ;;  %v491_v26 = vpack.c.bf16 %v1014_v38, %v1010_v19 }
 0x20d   : > { %1019 = vpow2.f32 %v427_v39  ;;  %v404_v44 = vsub.f32 %v1190_v27, %v380_v41  ;;  %457 = vadd.xlane.f32.xlu0 %v456_v42  ;;  %v439_v27 = vmul.f32 1.442695, %v408_v47 }
 0x20e   : > { %944 = vmatprep.mubr.msk.bf16.mxu1 %vm344_vm2, %v491_v26 }
 0x20f   : > { %v1016_v45 = vpop.eup %1015  ;;  %v431_v46 = vmul.f32 1.442695, %v404_v44  ;;  %945 = vmatmul.mubr.msk.bf16.gmra.mrb[4].mxu1 %vm344_vm2, %v492_v37 }
 0x210   : > { %v383_v48 = vpop.xlane.xlu1 %382  ;;  %v471_v34 = vsel %vm344_vm2, %v1016_v45, 0.0 }
 0x211   : > { %1021 = vpow2.f32 %v431_v46  ;;  %v405_v49 = vsub.f32 %v1198_v31, %v383_v48  ;;  %472 = vadd.xlane.f32.xlu1 %v471_v34 }
 0x212   : > { %1023 = vpow2.f32 %v435_v28 }
 0x213   : > { %v1018_v50 = vpop.eup %1017  ;;  %v433_v51 = vmul.f32 1.442695, %v405_v49 }
 0x214   : > { %v389_v52 = vpop.xlane.xlu1 %388  ;;  %v465_v53 = vsel %vm344_vm2, %v1018_v50, 0.0 }
 0x215   : > { %1025 = vpow2.f32 %v433_v51  ;;  %v407_v54 = vsub.f32 %v1196_v30, %v389_v52  ;;  %466 = vadd.xlane.f32.xlu1 %v465_v53 }
 0x216   : > { %1027 = vpow2.f32 %v439_v27 }
 0x217   : > { %v1020_v55 = vpop.eup %1019  ;;  %v437_v33 = vmul.f32 1.442695, %v407_v54 }
 0x218   : > { %v493_v56 = vpack.c.bf16 %v1020_v55, %v1018_v50  ;;  %v468_v61 = vsel %vm344_vm2, %v1020_v55, 0.0 }
 0x219   : > { %1029 = vpow2.f32 %v437_v33 }
 0x21a   : > { %948 = vmatprep.mubr.msk.bf16.mxu1 %vm344_vm2, %v493_v56 }
 0x21b   : > { %v1022_v31 = vpop.eup %1021 }
 0x21c   : > { %v474_v57 = vsel %vm344_vm2, %v1022_v31, 0.0  ;;  %v494_v58 = vpack.c.bf16 %v1022_v31, %v1016_v45  ;;  %v1024_v59 = vpop.eup %1023 }
 0x21d   : > { %475 = vadd.xlane.f32.xlu0 %v474_v57  ;;  %v480_v2 = vsel %vm344_vm2, %v1024_v59, 0.0 }
 0x21e   : > { %949 = vmatmul.mubr.msk.bf16.gmra.mrb[8].mxu1 %vm344_vm2, %v494_v58 }
 0x21f   : > { %v1026_v60 = vpop.eup %1025 }
 0x220   : > { %v477_v30 = vsel %vm344_vm2, %v1026_v60, 0.0  ;;  %v495_v62 = vpack.c.bf16 %v1024_v59, %v1026_v60  ;;  %v1028_v63 = vpop.eup %1027 }
 0x221   : > { %469 = vadd.xlane.f32.xlu0 %v468_v61  ;;  %478 = vadd.xlane.f32.xlu1 %v477_v30  ;;  %v486_v4 = vsel %vm344_vm2, %v1028_v63, 0.0 }
 0x222   : > { %952 = vmatprep.mubr.msk.bf16.mxu1 %vm344_vm2, %v495_v62 }
 0x223   : > { %v1030_v0 = vpop.eup %1029 }
 0x224   : > { %v483_v1 = vsel %vm344_vm2, %v1030_v0, 0.0  ;;  %v496_v3 = vpack.c.bf16 %v1028_v63, %v1030_v0 }
 0x225   : > { %484 = vadd.xlane.f32.xlu1 %v483_v1  ;;  %481 = vadd.xlane.f32.xlu0 %v480_v2 }
 0x226   : > { %953 = vmatmul.mubr.msk.bf16.gmra.mrb[12].mxu1 %vm344_vm2, %v496_v3 }
 0x229   : > { %487 = vadd.xlane.f32.xlu0 %v486_v4 }
 0x282   : > { %v449_v5 = vpop.xlane.xlu1 %448 }
 0x283   : > { %1031 = vrcp.f32 %v449_v5 }
 0x286   : > { %v452_v6 = vpop.xlane.xlu0 %451  ;;  %v443_v7 = vpop.xlane.xlu1 %442 }
 0x287   : > { %1033 = vrcp.f32 %v443_v7 }
 0x288   : > { %1035 = vrcp.f32 %v452_v6 }
 0x28a   : > { %v446_v8 = vpop.xlane.xlu0 %445 }
 0x28b   : > { %1037 = vrcp.f32 %v446_v8 }
 0x28d   : > { %v1032_v10 = vpop.eup %1031 }
 0x28e   : > { %v461_v9 = vpop.xlane.xlu1 %460 }
 0x28f   : > { %1039 = vrcp.f32 %v461_v9 }
 0x291   : > { %v1034_v13 = vpop.eup %1033 }
 0x292   : > { %v1036_v16 = vpop.eup %1035  ;;  %v455_v22 = vpop.xlane.xlu1 %454 }
 0x293   : > { %1041 = vrcp.f32 %v455_v22 }
 0x295   : > { %v1038_v19 = vpop.eup %1037 }
 0x296   : > { %v464_v11 = vpop.xlane.xlu0 %463 }
 0x297   : > { %1043 = vrcp.f32 %v464_v11 }
 0x299   : > { %v1040_v39 = vpop.eup %1039 }
 0x29a   : > { %v458_v35 = vpop.xlane.xlu0 %457 }
 0x29b   : > { %1045 = vrcp.f32 %v458_v35 }
 0x29d   : > { %v1042_v42 = vpop.eup %1041 }
 0x29e   : > { %v473_v37 = vpop.xlane.xlu1 %472 }
 0x29f   : > { %1047 = vrcp.f32 %v473_v37 }
 0x2a1   : > { %v1044_v44 = vpop.eup %1043 }
 0x2a2   : > { %v467_v38 = vpop.xlane.xlu1 %466 }
 0x2a3   : > { %1049 = vrcp.f32 %v467_v38 }
 0x2a5   : > { %v1046_v28 = vpop.eup %1045 }
 0x2a9   : > { %v1048_v33 = vpop.eup %1047 }
 0x2aa   : > { %v476_v24 = vpop.xlane.xlu0 %475 }
 0x2ab   : > { %1051 = vrcp.f32 %v476_v24 }
 0x2ad   : > { %v1050_v31 = vpop.eup %1049 }
 0x2ae   : > { %v470_v40 = vpop.xlane.xlu0 %469  ;;  %v479_v49 = vpop.xlane.xlu1 %478 }
 0x2af   : > { %1053 = vrcp.f32 %v470_v40 }
 0x2b2   : > { %v482_v52 = vpop.xlane.xlu0 %481  ;;  %v485_v54 = vpop.xlane.xlu1 %484 }
 0x2b3   : > { %1055 = vrcp.f32 %v485_v54 }
 0x2b4   : > { %1057 = vrcp.f32 %v479_v49 }
 0x2b5   : > { %v1052_v59 = vpop.eup %1051 }
 0x2b6   : > { %v488_v55 = vpop.xlane.xlu0 %487 }
 0x2b7   : > { %1059 = vrcp.f32 %v488_v55 }
 0x2b8   : > { %1061 = vrcp.f32 %v482_v52 }
 0x2b9   : > { %v1054_v30 = vpop.eup %1053 }
 0x2bd   : > { %v1056_v5 = vpop.eup %1055 }
 0x2be   : > { %v1058_v7 = vpop.eup %1057 }
 0x2d2   : > { %v942_v12 = vpop.f32.mrb[0].mxu1 }
 0x2d3   : > { %v639_v14 = vmul.f32 %v1032_v10, %v942_v12  ;;  %v558_v15 = vpop.f32.mrb[1].mxu1  ;;  %v1060_v10 = vpop.eup %1059 }
 0x2d4   : > { %v637_v17 = vmul.f32 %v1034_v13, %v558_v15  ;;  %v943_v18 = vpop.f32.mrb[2].mxu1  ;;  %v1062_v13 = vpop.eup %1061 }
 0x2d5   : > { %v888_v20 = vpack.c.bf16 %v639_v14, %v639_v14  ;;  %v640_v21 = vmul.f32 %v1036_v16, %v943_v18  ;;  %v561_v23 = vpop.f32.mrb[3].mxu1 }
 0x2d6   : > { %v886_v25 = vpack.c.bf16 %v637_v17, %v637_v17  ;;  %v638_v29 = vmul.f32 %v1038_v19, %v561_v23 }
 0x2d7   : > { %720 = vst.msk [vmem:[%s1265_s5 + $0x8] sm:$0xf] %vm717_vm3, %v888_v20  ;;  %v889_v32 = vpack.c.bf16 %v640_v21, %v640_v21 }
 0x2d8   : > { %718 = vst.msk [vmem:[%s1265_s5] sm:$0xf] %vm717_vm3, %v886_v25  ;;  %v887_v36 = vpack.c.bf16 %v638_v29, %v638_v29 }
 0x2d9   : > { %721 = vst.msk [vmem:[%s1265_s5 + $0xc] sm:$0xf] %vm717_vm3, %v889_v32 }
 0x2da   : > { %719 = vst.msk [vmem:[%s1265_s5 + $0x4] sm:$0xf] %vm717_vm3, %v887_v36 }
 0x2e2   : > { %v946_v41 = vpop.f32.mrb[4].mxu1 }
 0x2e3   : > { %v643_v26 = vmul.f32 %v1040_v39, %v946_v41  ;;  %v574_v43 = vpop.f32.mrb[5].mxu1 }
 0x2e4   : > { %v641_v45 = vmul.f32 %v1042_v42, %v574_v43  ;;  %v947_v46 = vpop.f32.mrb[6].mxu1 }
 0x2e5   : > { %v892_v47 = vpack.c.bf16 %v643_v26, %v643_v26  ;;  %v644_v48 = vmul.f32 %v1044_v44, %v947_v46  ;;  %v577_v34 = vpop.f32.mrb[7].mxu1 }
 0x2e6   : > { %v890_v50 = vpack.c.bf16 %v641_v45, %v641_v45  ;;  %v642_v51 = vmul.f32 %v1046_v28, %v577_v34 }
 0x2e7   : > { %724 = vst.msk [vmem:[%s1265_s5 + $0x18] sm:$0xf] %vm717_vm3, %v892_v47  ;;  %v893_v27 = vpack.c.bf16 %v644_v48, %v644_v48 }
 0x2e8   : > { %722 = vst.msk [vmem:[%s1265_s5 + $0x10] sm:$0xf] %vm717_vm3, %v890_v50  ;;  %v891_v53 = vpack.c.bf16 %v642_v51, %v642_v51 }
 0x2e9   : > { %725 = vst.msk [vmem:[%s1265_s5 + $0x1c] sm:$0xf] %vm717_vm3, %v893_v27 }
 0x2ea   : > { %723 = vst.msk [vmem:[%s1265_s5 + $0x14] sm:$0xf] %vm717_vm3, %v891_v53 }
 0x2f1   : > { %v950_v56 = vpop.f32.mrb[8].mxu1 }
 0x2f2   : > { %v647_v57 = vmul.f32 %v1048_v33, %v950_v56  ;;  %v590_v58 = vpop.f32.mrb[9].mxu1 }
 0x2f3   : > { %v645_v60 = vmul.f32 %v1050_v31, %v590_v58  ;;  %v951_v61 = vpop.f32.mrb[10].mxu1 }
 0x2f4   : > { %v896_v62 = vpack.c.bf16 %v647_v57, %v647_v57  ;;  %v648_v63 = vmul.f32 %v1052_v59, %v951_v61  ;;  %v593_v0 = vpop.f32.mrb[11].mxu1 }
 0x2f5   : > { %v894_v1 = vpack.c.bf16 %v645_v60, %v645_v60  ;;  %v646_v2 = vmul.f32 %v1054_v30, %v593_v0 }
 0x2f6   : > { %728 = vst.msk [vmem:[%s1265_s5 + $0x28] sm:$0xf] %vm717_vm3, %v896_v62  ;;  %v897_v3 = vpack.c.bf16 %v648_v63, %v648_v63 }
 0x2f7   : > { %726 = vst.msk [vmem:[%s1265_s5 + $0x20] sm:$0xf] %vm717_vm3, %v894_v1  ;;  %v895_v4 = vpack.c.bf16 %v646_v2, %v646_v2 }
 0x2f8   : > { %729 = vst.msk [vmem:[%s1265_s5 + $0x2c] sm:$0xf] %vm717_vm3, %v897_v3 }
 0x2f9   : > { %727 = vst.msk [vmem:[%s1265_s5 + $0x24] sm:$0xf] %vm717_vm3, %v895_v4  ;;  %v954_v6 = vpop.f32.mrb[12].mxu1 }
 0x2fa   : > { %v651_v8 = vmul.f32 %v1056_v5, %v954_v6  ;;  %v606_v9 = vpop.f32.mrb[13].mxu1 }
 0x2fb   : > { %v649_v11 = vmul.f32 %v1058_v7, %v606_v9  ;;  %v955_v12 = vpop.f32.mrb[14].mxu1 }
 0x2fc   : > { %v900_v14 = vpack.c.bf16 %v651_v8, %v651_v8  ;;  %v652_v15 = vmul.f32 %v1060_v10, %v955_v12  ;;  %v609_v16 = vpop.f32.mrb[15].mxu1 }
 0x2fd   : > { %v898_v17 = vpack.c.bf16 %v649_v11, %v649_v11  ;;  %v650_v18 = vmul.f32 %v1062_v13, %v609_v16 }
 0x2fe   : > { %732 = vst.msk [vmem:[%s1265_s5 + $0x38] sm:$0xf] %vm717_vm3, %v900_v14  ;;  %v901_v19 = vpack.c.bf16 %v652_v15, %v652_v15 }
 0x2ff   : > { %730 = vst.msk [vmem:[%s1265_s5 + $0x30] sm:$0xf] %vm717_vm3, %v898_v17  ;;  %v899_v20 = vpack.c.bf16 %v650_v18, %v650_v18 }
 0x300   : > { %733 = vst.msk [vmem:[%s1265_s5 + $0x3c] sm:$0xf] %vm717_vm3, %v901_v19 }
 0x301   : > { %731 = vst.msk [vmem:[%s1265_s5 + $0x34] sm:$0xf] %vm717_vm3, %v899_v20 }
 0x302 PF: > { %s12_s13 = sadd.s32 1, %s1101_s13   ;;  %s1317_s9 = smov %s1093_s11 }
 0x303   : > { %p9_p8 = scmp.ge.s32.totalorder %s12_s13, 10   ;;  %s1318_s10 = smov %s1097_s12 }
 0x304   : > { %s1319_s11 = smov %s1322_s14  ;;  %s1320_s12 = smov %s1326_s15 }
 0x305   :  { %11 = sbr.rel (!%p9_p8) target bundleno = 3 (0x3), region = 61 }

// kernel: upsampling_agg_block.5
= control target key start
LH: loop header
LB: loop body
LE: loop exit
PB: predicated region body
PF: predicated region fallthrough
CT: control target
= control target key end

     0   :  { %s624_s15 = smov 0   ;;  %s626_s16 = smov 0   ;;  %s674_s0 = inlined_call_operand.vmem [shape: bf16[2,8,512], index: 0, kind: input, shape index: {}]   ;;  %s675_s1 = inlined_call_operand.vmem [shape: bf16[4,8], index: 1, kind: input, shape index: {}]   ;;  %s676_s2 = inlined_call_operand.vmem [shape: f32[4,1], index: 2, kind: input, shape index: {}]   ;;  %s677_s3 = inlined_call_operand.vmem [shape: bf16[2,4,512], index: 3, kind: input, shape index: {}]   ;;  %s678_s4 = inlined_call_operand.vmem [shape: f32[2,4,512], index: 4, kind: output, shape index: {}]  }
   0x1   :  { %s628_s17 = smov 0  }
   0x2 LB: > { %s26_s18 = sadd.s32 1, %s592_s16  ;;  %p524_p0 = scmp.ge.s32.totalorder %s596_s17, 1  ;;  %s596_s17 = sphi %s628_s17, %s14_s17   ;;  %s592_s16 = sphi %s626_s16, %s680_s16   ;;  %s588_s15 = sphi %s624_s15, %s679_s15  }
   0x3   : > { %p28_p1 = scmp.ge.s32.totalorder %s26_s18, 2  ;;  %p200_p2 = scmp.lt.s32.totalorder %s596_s17, 3 }
   0x5   : > { %s682_s18 = smov (%p28_p1, %s26_s18), 0  ;;  %p201_p3 = pnand %p524_p0, %p200_p2 }
   0x6   : > { %p244_p4 = scmp.lt.s32.totalorder (!%p201_p3), %s588_s15, 1  ;;  %v598_v0 = vmov (!%p201_p3), 0   ;;  %v277_v1 = vld [vmem:[%s676_s2] sm:$0xf] (!%p201_p3)  ;;  %vm297_vm0 = vcmask (!%p201_p3), 1043456   ;;  %vm293_vm1 = vcmask (!%p201_p3), 64512  }
   0x7   : > { %204 = sbr.rel (%p201_p3) target bundleno = 244 (0xf4), region = 36  ;;  %342 = vmatprep.mubr.bf16.mxu0 (!%p201_p3), %v598_v0  ;;  %383 = vmatprep.mubr.bf16.mxu1 (!%p201_p3), %v598_v0  ;;  %v274_v10 = vld [vmem:[%s675_s1] sm:$0x3] (!%p201_p3) }
   0x8   : > { %569 = vset.pattern.permute.xlu0 (!%p201_p3), %v598_v0 }
   0x9   : > { %280 = vperm.xlu0 (!%p201_p3), %569, %v277_v1  }
   0xe   : > { %s684_s15 = smov (!%p244_p4, %s588_s15), 1 }
   0xf   : > { %s541_s21 = sshll.u32 %s684_s15, 4  ;;  %s542_s27 = sshll.u32 %s684_s15, 3 }
  0x10   : > { %s251_s24 = scalar_lea.vmem %s674_s0, %s541_s21  ;;  %s261_s30 = scalar_lea.vmem %s677_s3, %s542_s27 }
  0x11   : > { %v275_v2 = vld [vmem:[%s251_s24] sm:$0xff]  ;;  %v276_v3 = vld [vmem:[%s251_s24 + $0x8] sm:$0xff]  ;;  %s271_s7 = scalar_lea.vmem %s678_s4, %s541_s21 }
  0x12   : > { %v532_v4 = vcombine.high %v275_v2, %v275_v2  ;;  %v534_v5 = vcombine.high %v276_v3, %v276_v3  ;;  %v531_v6 = vcombine.low %v275_v2, %v275_v2  ;;  %v533_v7 = vcombine.low %v276_v3, %v276_v3  ;;  %v392_v11 = vld [vmem:[%s261_s30] sm:$0xff] }
  0x13   : > { %v393_v12 = vunpack.c.l.bf16 %v392_v11  ;;  %v394_v13 = vunpack.c.h.bf16 %v392_v11 }
  0x14   : > { %535 = vmatprep.subr.msk.bf16.mxu0 %vm297_vm0, %v532_v4  ;;  %537 = vmatprep.subr.msk.bf16.mxu1 %vm297_vm0, %v534_v5  ;;  %v299_v8 = vsel %vm297_vm0, %v531_v6, 0  ;;  %v305_v9 = vsel %vm297_vm0, %v533_v7, 0 }
  0x15   : > { %311 = vmatpush1.bf16.msra.mxu0 %v299_v8  ;;  %352 = vmatpush1.bf16.msra.mxu1 %v305_v9  ;;  %v397_v17 = vcombine.high %v393_v12, %v393_v12  ;;  %v398_v18 = vcombine.high %v394_v13, %v394_v13 }
  0x18   : > { %536 = vmatmul.mubr.msk.bf16.vlgmr.msra.gmra.mrb[0].mxu0 %vm293_vm1, %v274_v10  ;;  %538 = vmatmul.mubr.msk.bf16.vlgmr.msra.gmra.mrb[0].mxu1 %vm293_vm1, %v274_v10 }
  0x88   : > { %v281_v14 = vpop.permute.xlu0 %280 }
  0xeb   : > { %v344_v15 = vpop.f32.mrb[0].mxu0  ;;  %v385_v16 = vpop.f32.mrb[0].mxu1 }
  0xec   : > { %v345_v19 = vadd.f32 %v344_v15, %v281_v14  ;;  %v386_v20 = vadd.f32 %v385_v16, %v281_v14  ;;  %v346_v21 = vpop.f32.mrb[1].mxu0  ;;  %v387_v22 = vpop.f32.mrb[1].mxu1 }
  0xed   : > { %v347_v23 = vadd.f32 %v346_v21, %v281_v14  ;;  %v388_v24 = vadd.f32 %v387_v22, %v281_v14  ;;  %v348_v25 = vpop.f32.mrb[2].mxu0  ;;  %v389_v26 = vpop.f32.mrb[2].mxu1 }
  0xee   : > { %v401_v27 = vadd.f32 %v393_v12, %v345_v19  ;;  %v403_v28 = vadd.f32 %v394_v13, %v386_v20  ;;  %v349_v29 = vpop.f32.mrb[3].mxu0  ;;  %v390_v30 = vpop.f32.mrb[3].mxu1 }
  0xef   : > { %v402_v31 = vadd.f32 %v397_v17, %v347_v23  ;;  %v404_v32 = vadd.f32 %v398_v18, %v388_v24 }
  0xf1   : > { %v409_v33 = vcombine.low %v401_v27, %v402_v31  ;;  %v410_v34 = vcombine.low %v403_v28, %v404_v32 }
  0xf3   : > { %413 = vst [vmem:[%s271_s7] sm:$0xff] %v409_v33  ;;  %414 = vst [vmem:[%s271_s7 + $0x8] sm:$0xff] %v410_v34 }
  0xf4 PF: > { %s14_s17 = sadd.s32 1, %s596_s17   ;;  %s679_s15 = smov %s592_s16 }
  0xf5   : > { %p11_p5 = scmp.ge.s32.totalorder %s14_s17, 4   ;;  %s680_s16 = smov %s682_s18 }
  0xf7   :  { %13 = sbr.rel (!%p11_p5) target bundleno = 2 (0x2), region = 69 }

</bundles_post_ra>
